<compile_context>
chip_gen: v7x
topology: tpu7x:2x2x1
jax: 0.10.0
libtpu: 0.0.40
codegen_flags: <defaults>
</compile_context>

<pallas_src>
import math
import jax
import jax.numpy as jnp
from jax import lax
from jax.experimental import pallas as pl
from jax.experimental.pallas import tpu as pltpu


# ----------------------------------------------------------------------------
# Kernel
# ----------------------------------------------------------------------------
def _make_kernel(heads: int, head_dim: int, compute_dtype):
    """Builds the SpatialMSA kernel for one block of `block_b` batch elems."""
    inner = heads * head_dim
    exact_recip = jnp.dtype(compute_dtype) == jnp.dtype(jnp.float32)

    def kernel(x_msi_ref, x_fu_ref, wq_ref, wk_ref, wv_ref, wp_ref, bp_ref,
               mask_ref, out_ref):
        # x_msi_ref / x_fu_ref : (block_b, c, d)
        # wq/wk/wv_ref         : (d, inner)
        # wp_ref               : (inner, d)
        # bp_ref               : (1, d)
        # mask_ref             : (inner, inner) additive block-diagonal mask
        # out_ref              : (block_b, c, d)
        bt, c, d = x_msi_ref.shape

        xm = x_msi_ref[...].reshape(bt * c, d).astype(compute_dtype)
        xf = x_fu_ref[...].reshape(bt * c, d).astype(compute_dtype)

        # ---- Q/K/V projections (MXU, f32 accumulation) ----
        # Wk and Wv stay separate: same MXU push count as a fused (d, 2*inner)
        # weight, but no lane-32 slice/relayout of the fused result.
        q = jnp.dot(xm, wq_ref[...],
                    preferred_element_type=jnp.float32).reshape(bt, c, inner)
        k = jnp.dot(xf, wk_ref[...],
                    preferred_element_type=jnp.float32).reshape(bt, c, inner)
        v = jnp.dot(xf, wv_ref[...],
                    preferred_element_type=jnp.float32).reshape(bt, c, inner)

        # F.normalize over the "c" axis (per column, per batch elem):
        # x / max(||x||, eps)  ==  x * rsqrt(max(sumsq, eps^2))
        eps2 = jnp.float32(1e-24)
        qn = q * lax.rsqrt(jnp.maximum(jnp.sum(q * q, axis=1, keepdims=True), eps2))
        kn = k * lax.rsqrt(jnp.maximum(jnp.sum(k * k, axis=1, keepdims=True), eps2))

        # ---- fused all-heads attention, block-diagonal mask ----
        # Scores lie in [-1, 1] after L2 normalization, so no max-shift is
        # needed; masked -1e30 logits underflow exp() to exactly 0 in f32.
        # (Possible further opt per review: lane-pack this K=c, N=inner batched
        #  einsum against a block-diagonal RHS once a bundle dump confirms the
        #  MXU push slot is binding at large block_b.)
        scores = jnp.einsum('bci,bcj->bij', kn, qn,
                            preferred_element_type=jnp.float32)   # (bt, inner, inner)
        p = jnp.exp(scores + mask_ref[...][None, :, :])
        denom = jnp.sum(p, axis=-1)                               # (bt, inner)

        # Apply un-normalized weights first, divide afterwards (the reciprocal
        # then touches only (bt, c, inner) instead of (bt, inner, inner)).
        cat = jnp.einsum('bcj,bij->bci', v, p,
                         preferred_element_type=jnp.float32)      # (bt, c, inner)
        inv = pl.reciprocal(denom, approx=not exact_recip)
        cat = cat * inv[:, None, :]

        # ---- output projection + exact (erf) GELU ----
        proj = jnp.dot(cat.reshape(bt * c, inner).astype(compute_dtype),
                       wp_ref[...], preferred_element_type=jnp.float32)
        proj = proj + bp_ref[...]
        out = 0.5 * proj * (1.0 + lax.erf(proj * jnp.float32(0.7071067811865476)))

        out_ref[...] = out.reshape(bt, c, d).astype(out_ref.dtype)

    return kernel


# ----------------------------------------------------------------------------
# Parameter preparation (hoisted out of the per-call hot path)
# ----------------------------------------------------------------------------
def prepare_spatial_msa_params(wq, wk, wv, wp, bp, *, heads, head_dim,
                               compute_dtype=jnp.bfloat16):
    """Cast weights once and build the constant block-diagonal mask."""
    inner = heads * head_dim
    d = wq.shape[0]
    assert wq.shape == (d, inner) and wk.shape == (d, inner)
    assert wv.shape == (d, inner) and wp.shape == (inner, d)
    row_h = jnp.arange(inner)[:, None] // head_dim
    col_h = jnp.arange(inner)[None, :] // head_dim
    mask = jnp.where(row_h == col_h, 0.0, -1e30).astype(jnp.float32)
    return dict(
        wq=wq.astype(compute_dtype),
        wk=wk.astype(compute_dtype),
        wv=wv.astype(compute_dtype),
        wp=wp.astype(compute_dtype),
        bp=bp.reshape(1, d).astype(jnp.float32),
        mask=mask,
        heads=heads, head_dim=head_dim, compute_dtype=compute_dtype,
    )


# ----------------------------------------------------------------------------
# Block-size selection (generation-aware)
# ----------------------------------------------------------------------------
def _is_multi_tensorcore_chip():
    # v7x has 2 TensorCores per chip (grid sharded via dimension_semantics);
    # v5e / v6e have one.  Fall back to single-core assumption on any failure.
    try:
        kind = jax.devices()[0].device_kind.lower()
    except Exception:
        return False
    return "v7" in kind


def _estimate_step_vmem_bytes(block_b, c, d, inner, in_itemsize, out_itemsize,
                              compute_itemsize):
    lane = 128
    pad_inner = max(inner, lane)
    # Double-buffered input/output blocks managed by the BlockSpec pipeline.
    io = 2 * block_b * c * d * (2 * in_itemsize + out_itemsize)
    # Main in-kernel temporaries (f32, lane-padded where last dim < 128).
    tmp = 2 * block_b * c * d * compute_itemsize          # xm / xf casts
    tmp += 5 * block_b * c * pad_inner * 4                # q, k, v, qn, kn
    tmp += 2 * block_b * inner * pad_inner * 4            # scores / p
    tmp += 2 * block_b * c * pad_inner * 4                # cat (x2)
    tmp += 2 * block_b * c * d * 4                        # proj / gelu out
    return io + tmp


def _choose_block_b(b, c, d, inner, in_itemsize, out_itemsize,
                    compute_itemsize, multi_core,
                    budget_bytes=20 * 1024 * 1024):
    divisors = [x for x in range(1, b + 1) if b % x == 0]
    fits = [blk for blk in divisors
            if _estimate_step_vmem_bytes(blk, c, d, inner, in_itemsize,
                                         out_itemsize, compute_itemsize)
            <= budget_bytes]
    if not fits:
        return 1
    if multi_core:
        # Prefer an even (>= 2) number of grid steps so both TensorCores get an
        # equal share; fall back to the biggest fitting block otherwise.
        even = [blk for blk in fits if (b // blk) >= 2 and (b // blk) % 2 == 0]
        if even:
            return max(even)
    # Single-TensorCore chips: the grid is a serial loop, so take the biggest
    # block that fits (grid=(1,) for small b).
    return max(fits)


# ----------------------------------------------------------------------------
# Wrapper
# ----------------------------------------------------------------------------
def spatial_msa_pallas(x_msi, x_fu, params, *, block_b=None, out_dtype=None):
    """x_msi, x_fu: (b, c, w, h); output dtype follows the input dtype."""
    b, c, w, h = x_msi.shape
    d = w * h
    heads, head_dim = params["heads"], params["head_dim"]
    inner = heads * head_dim
    compute_dtype = params["compute_dtype"]
    out_dtype = out_dtype or x_msi.dtype   # bf16-in -> bf16-out, no extra cast pass

    in_itemsize = jnp.dtype(x_msi.dtype).itemsize
    out_itemsize = jnp.dtype(out_dtype).itemsize
    comp_itemsize = jnp.dtype(compute_dtype).itemsize
    multi_core = _is_multi_tensorcore_chip()

    if block_b is None:
        block_b = _choose_block_b(b, c, d, inner, in_itemsize, out_itemsize,
                                  comp_itemsize, multi_core)
    block_b = max(1, min(block_b, b))
    while b % block_b != 0:
        block_b -= 1
    nb = b // block_b

    x_msi_r = x_msi.reshape(b, c, d)
    x_fu_r = x_fu.reshape(b, c, d)

    kernel = _make_kernel(heads, head_dim, compute_dtype)

    flops = int(2 * b * c * d * 3 * inner            # QKV projections
                + 2 * b * c * inner * inner * 2      # scores + apply
                + 2 * b * c * inner * d)             # output projection
    transcendentals = int(b * inner * inner + b * c * d)
    bytes_accessed = int(b * c * d * (2 * in_itemsize + out_itemsize)
                         + (4 * d * inner + d) * comp_itemsize
                         + inner * inner * 4)

    out = pl.pallas_call(
        kernel,
        out_shape=jax.ShapeDtypeStruct((b, c, d), out_dtype),
        grid_spec=pltpu.PrefetchScalarGridSpec(
            num_scalar_prefetch=0,
            grid=(nb,),
            in_specs=[
                pl.BlockSpec((block_b, c, d), lambda i: (i, 0, 0)),    # x_msi
                pl.BlockSpec((block_b, c, d), lambda i: (i, 0, 0)),    # x_fu
                pl.BlockSpec((d, inner), lambda i: (0, 0)),            # Wq
                pl.BlockSpec((d, inner), lambda i: (0, 0)),            # Wk
                pl.BlockSpec((d, inner), lambda i: (0, 0)),            # Wv
                pl.BlockSpec((inner, d), lambda i: (0, 0)),            # Wp
                pl.BlockSpec((1, d), lambda i: (0, 0)),                # bias
                pl.BlockSpec((inner, inner), lambda i: (0, 0)),        # mask
            ],
            out_specs=pl.BlockSpec((block_b, c, d), lambda i: (i, 0, 0)),
        ),
        compiler_params=pltpu.CompilerParams(
            dimension_semantics=("parallel",),
            # Explicit limit: raises v5e's 16 MiB default, matches the 32 MiB
            # default on v7x (64 MiB physical/TC), leaves headroom everywhere.
            vmem_limit_bytes=32 * 1024 * 1024,
        ),
        cost_estimate=pl.CostEstimate(flops=flops,
                                      transcendentals=transcendentals,
                                      bytes_accessed=bytes_accessed),
    )(x_msi_r, x_fu_r, params["wq"], params["wk"], params["wv"],
      params["wp"], params["bp"], params["mask"])

    return out.reshape(b, c, w, h)


# ----------------------------------------------------------------------------
# Pure-JAX f32 reference matching the PyTorch forward exactly
# ----------------------------------------------------------------------------
def spatial_msa_reference(x_msi, x_fu, wq, wk, wv, wp, bp, *, heads, head_dim):
    b, c, w, h = x_msi.shape
    d = w * h
    xm = x_msi.reshape(b, c, d)
    xf = x_fu.reshape(b, c, d)
    q_inp = xm @ wq
    k_inp = xf @ wk
    v_inp = xf @ wv

    def split(t):  # 'b n (h d) -> b h n d'
        return t.reshape(b, c, heads, head_dim).transpose(0, 2, 1, 3)

    q, k, v = split(q_inp), split(k_inp), split(v_inp)
    q = jnp.swapaxes(q, -2, -1)   # (b, H, Dh, c)
    k = jnp.swapaxes(k, -2, -1)
    v = jnp.swapaxes(v, -2, -1)
    q = q / jnp.maximum(jnp.linalg.norm(q, axis=-1, keepdims=True), 1e-12)
    k = k / jnp.maximum(jnp.linalg.norm(k, axis=-1, keepdims=True), 1e-12)
    attn = k @ jnp.swapaxes(q, -2, -1)            # (b, H, Dh, Dh)
    attn = jax.nn.softmax(attn, axis=-1)
    x = attn @ v                                   # (b, H, Dh, c)
    x = x.transpose(0, 3, 1, 2).reshape(b, c, heads * head_dim)
    out = x @ wp + bp
    out = jax.nn.gelu(out, approximate=False)
    return out.reshape(b, c, w, h)


if __name__ == "__main__":
    HEADS, HEAD_DIM = 4, 8

    def make_case(key, b, c, w, h):
        d = w * h
        inner = HEADS * HEAD_DIM
        ks = jax.random.split(key, 7)
        x_msi = jax.random.normal(ks[0], (b, c, w, h), dtype=jnp.float32)
        x_fu = jax.random.normal(ks[1], (b, c, w, h), dtype=jnp.float32)
        scale = 1.0 / math.sqrt(d)
        wq = jax.random.normal(ks[2], (d, inner), dtype=jnp.float32) * scale
        wk = jax.random.normal(ks[3], (d, inner), dtype=jnp.float32) * scale
        wv = jax.random.normal(ks[4], (d, inner), dtype=jnp.float32) * scale
        wp = jax.random.normal(ks[5], (inner, d), dtype=jnp.float32) * (
            1.0 / math.sqrt(inner))
        bp = jax.random.normal(ks[6], (d,), dtype=jnp.float32) * 0.01
        return (x_msi, x_fu, wq, wk, wv, wp, bp)

    key = jax.random.PRNGKey(0)
    k_small, k_big = jax.random.split(key)

    # --- small case b=2, f32 compute path (tight check, exact reciprocal) ---
    x_msi, x_fu, wq, wk, wv, wp, bp = make_case(k_small, 2, 8, 16, 16)
    ref = spatial_msa_reference(x_msi, x_fu, wq, wk, wv, wp, bp,
                                heads=HEADS, head_dim=HEAD_DIM)

    params_f32 = prepare_spatial_msa_params(wq, wk, wv, wp, bp, heads=HEADS,
                                            head_dim=HEAD_DIM,
                                            compute_dtype=jnp.float32)
    out_f32 = jax.block_until_ready(spatial_msa_pallas(x_msi, x_fu, params_f32))
    assert out_f32.shape == ref.shape
    assert jnp.allclose(out_f32, ref, atol=2e-3, rtol=2e-3), (
        float(jnp.max(jnp.abs(out_f32 - ref))))

    # --- bf16 MXU path, f32 I/O ---------------------------------------------
    params_bf16 = prepare_spatial_msa_params(wq, wk, wv, wp, bp, heads=HEADS,
                                             head_dim=HEAD_DIM,
                                             compute_dtype=jnp.bfloat16)
    out_bf16 = jax.block_until_ready(spatial_msa_pallas(x_msi, x_fu, params_bf16))
    assert jnp.allclose(out_bf16, ref, atol=5e-2, rtol=5e-2), (
        float(jnp.max(jnp.abs(out_bf16 - ref))))

    # --- larger batch b=64, bf16 MXU, prepared weights reused ----------------
    x_msi2, x_fu2, wq2, wk2, wv2, wp2, bp2 = make_case(k_big, 64, 8, 16, 16)
    ref2 = spatial_msa_reference(x_msi2, x_fu2, wq2, wk2, wv2, wp2, bp2,
                                 heads=HEADS, head_dim=HEAD_DIM)
    params2 = prepare_spatial_msa_params(wq2, wk2, wv2, wp2, bp2, heads=HEADS,
                                         head_dim=HEAD_DIM)
    out2 = jax.block_until_ready(spatial_msa_pallas(x_msi2, x_fu2, params2))
    assert jnp.allclose(out2, ref2, atol=5e-2, rtol=5e-2), (
        float(jnp.max(jnp.abs(out2 - ref2))))

    # --- bf16 activation boundary (producer feeds bf16, output stays bf16) ---
    x_msi_bf = x_msi2.astype(jnp.bfloat16)
    x_fu_bf = x_fu2.astype(jnp.bfloat16)
    ref_bf = spatial_msa_reference(x_msi_bf.astype(jnp.float32),
                                   x_fu_bf.astype(jnp.float32),
                                   wq2, wk2, wv2, wp2, bp2,
                                   heads=HEADS, head_dim=HEAD_DIM)
    out_bf = jax.block_until_ready(spatial_msa_pallas(x_msi_bf, x_fu_bf, params2))
    assert out_bf.dtype == jnp.bfloat16
    assert jnp.allclose(out_bf.astype(jnp.float32), ref_bf,
                        atol=1e-1, rtol=1e-1), (
        float(jnp.max(jnp.abs(out_bf.astype(jnp.float32) - ref_bf))))

    print("KERNEL_OK")
</pallas_src>

<mosaic_0001>
module attributes {stable_mosaic.version = 11 : i64} {
  func.func @kernel(%arg0: i32, %arg1: memref<2x8x256xf32, #tpu.memory_space<vmem>>, %arg2: memref<2x8x256xf32, #tpu.memory_space<vmem>>, %arg3: memref<256x32xf32, #tpu.memory_space<vmem>>, %arg4: memref<256x32xf32, #tpu.memory_space<vmem>>, %arg5: memref<256x32xf32, #tpu.memory_space<vmem>>, %arg6: memref<32x256xf32, #tpu.memory_space<vmem>>, %arg7: memref<1x256xf32, #tpu.memory_space<vmem>>, %arg8: memref<32x32xf32, #tpu.memory_space<vmem>>, %arg9: memref<2x8x256xf32, #tpu.memory_space<vmem>>) attributes {dimension_semantics = [#tpu.dimension_semantics<parallel>], iteration_bounds = array<i64: 1>, scalar_prefetch = 0 : i64, scratch_operands = 0 : i64, tpu.core_type = #tpu.core_type<tc>, window_params = [{transform_indices = @transform_0, window_bounds = array<i64: 2, 8, 256>}, {transform_indices = @transform_1, window_bounds = array<i64: 2, 8, 256>}, {pipeline_mode = #tpu.pipeline_mode<synchronous>, transform_indices = @transform_2, window_bounds = array<i64: 256, 32>}, {pipeline_mode = #tpu.pipeline_mode<synchronous>, transform_indices = @transform_3, window_bounds = array<i64: 256, 32>}, {pipeline_mode = #tpu.pipeline_mode<synchronous>, transform_indices = @transform_4, window_bounds = array<i64: 256, 32>}, {pipeline_mode = #tpu.pipeline_mode<synchronous>, transform_indices = @transform_5, window_bounds = array<i64: 32, 256>}, {pipeline_mode = #tpu.pipeline_mode<synchronous>, transform_indices = @transform_6, window_bounds = array<i64: 1, 256>}, {pipeline_mode = #tpu.pipeline_mode<synchronous>, transform_indices = @transform_7, window_bounds = array<i64: 32, 32>}, {transform_indices = @transform_8, window_bounds = array<i64: 2, 8, 256>}]} {
    %c0 = arith.constant 0 : index
    %c0_0 = arith.constant 0 : index
    %c0_1 = arith.constant 0 : index
    %0 = vector.load %arg1[%c0, %c0_0, %c0_1] : memref<2x8x256xf32, #tpu.memory_space<vmem>>, vector<2x8x256xf32>
    %1 = vector.shape_cast %0 : vector<2x8x256xf32> to vector<16x256xf32>
    %c0_2 = arith.constant 0 : index
    %c0_3 = arith.constant 0 : index
    %c0_4 = arith.constant 0 : index
    %2 = vector.load %arg2[%c0_2, %c0_3, %c0_4] : memref<2x8x256xf32, #tpu.memory_space<vmem>>, vector<2x8x256xf32>
    %3 = vector.shape_cast %2 : vector<2x8x256xf32> to vector<16x256xf32>
    %c0_5 = arith.constant 0 : index
    %c0_6 = arith.constant 0 : index
    %4 = vector.load %arg3[%c0_5, %c0_6] : memref<256x32xf32, #tpu.memory_space<vmem>>, vector<256x32xf32>
    %cst = arith.constant dense<0.000000e+00> : vector<16x32xf32>
    %5 = tpu.matmul %1, %4, %cst {dimension_numbers = #tpu.dot_dimension_numbers<[1], [0], [0], [1], [0, 0, 1, 1], [], []>} : vector<16x256xf32>, vector<256x32xf32>, vector<16x32xf32> -> vector<16x32xf32>
    %6 = vector.shape_cast %5 : vector<16x32xf32> to vector<2x8x32xf32>
    %c0_7 = arith.constant 0 : index
    %c0_8 = arith.constant 0 : index
    %7 = vector.load %arg4[%c0_7, %c0_8] : memref<256x32xf32, #tpu.memory_space<vmem>>, vector<256x32xf32>
    %cst_9 = arith.constant dense<0.000000e+00> : vector<16x32xf32>
    %8 = tpu.matmul %3, %7, %cst_9 {dimension_numbers = #tpu.dot_dimension_numbers<[1], [0], [0], [1], [0, 0, 1, 1], [], []>} : vector<16x256xf32>, vector<256x32xf32>, vector<16x32xf32> -> vector<16x32xf32>
    %9 = vector.shape_cast %8 : vector<16x32xf32> to vector<2x8x32xf32>
    %c0_10 = arith.constant 0 : index
    %c0_11 = arith.constant 0 : index
    %10 = vector.load %arg5[%c0_10, %c0_11] : memref<256x32xf32, #tpu.memory_space<vmem>>, vector<256x32xf32>
    %cst_12 = arith.constant dense<0.000000e+00> : vector<16x32xf32>
    %11 = tpu.matmul %3, %10, %cst_12 {dimension_numbers = #tpu.dot_dimension_numbers<[1], [0], [0], [1], [0, 0, 1, 1], [], []>} : vector<16x256xf32>, vector<256x32xf32>, vector<16x32xf32> -> vector<16x32xf32>
    %12 = vector.shape_cast %11 : vector<16x32xf32> to vector<2x8x32xf32>
    %13 = arith.mulf %6, %6 : vector<2x8x32xf32>
    %cst_13 = arith.constant dense<0.000000e+00> : vector<2x32xf32>
    %14 = vector.multi_reduction <add>, %13, %cst_13 [1] : vector<2x8x32xf32> to vector<2x32xf32>
    %15 = vector.shape_cast %14 : vector<2x32xf32> to vector<2x1x32xf32>
    %cst_14 = arith.constant 1.000000e-24 : f32
    %16 = vector.broadcast %cst_14 : f32 to vector<2x1x32xf32>
    %17 = arith.maximumf %15, %16 : vector<2x1x32xf32>
    %18 = math.rsqrt %17 : vector<2x1x32xf32>
    %19 = vector.broadcast %18 : vector<2x1x32xf32> to vector<2x8x32xf32>
    %20 = arith.mulf %6, %19 : vector<2x8x32xf32>
    %21 = arith.mulf %9, %9 : vector<2x8x32xf32>
    %cst_15 = arith.constant dense<0.000000e+00> : vector<2x32xf32>
    %22 = vector.multi_reduction <add>, %21, %cst_15 [1] : vector<2x8x32xf32> to vector<2x32xf32>
    %23 = vector.shape_cast %22 : vector<2x32xf32> to vector<2x1x32xf32>
    %cst_16 = arith.constant 1.000000e-24 : f32
    %24 = vector.broadcast %cst_16 : f32 to vector<2x1x32xf32>
    %25 = arith.maximumf %23, %24 : vector<2x1x32xf32>
    %26 = math.rsqrt %25 : vector<2x1x32xf32>
    %27 = vector.broadcast %26 : vector<2x1x32xf32> to vector<2x8x32xf32>
    %28 = arith.mulf %9, %27 : vector<2x8x32xf32>
    "tpu.trace_start"() <{level = 10 : i32, message = "bci,bcj->bij"}> : () -> ()
    %cst_17 = arith.constant dense<0.000000e+00> : vector<2x32x32xf32>
    %29 = tpu.matmul %28, %20, %cst_17 {dimension_numbers = #tpu.dot_dimension_numbers<[1], [1], [2], [2], [0, 0, 0, 2, 1, 2], [0], [0]>} : vector<2x8x32xf32>, vector<2x8x32xf32>, vector<2x32x32xf32> -> vector<2x32x32xf32>
    "tpu.trace_stop"() : () -> ()
    %c0_18 = arith.constant 0 : index
    %c0_19 = arith.constant 0 : index
    %30 = vector.load %arg8[%c0_18, %c0_19] : memref<32x32xf32, #tpu.memory_space<vmem>>, vector<32x32xf32>
    %31 = vector.shape_cast %30 : vector<32x32xf32> to vector<1x32x32xf32>
    %32 = vector.broadcast %31 : vector<1x32x32xf32> to vector<2x32x32xf32>
    %33 = arith.addf %29, %32 : vector<2x32x32xf32>
    %34 = math.exp %33 : vector<2x32x32xf32>
    %cst_20 = arith.constant dense<0.000000e+00> : vector<2x32xf32>
    %35 = vector.multi_reduction <add>, %34, %cst_20 [2] : vector<2x32x32xf32> to vector<2x32xf32>
    "tpu.trace_start"() <{level = 10 : i32, message = "bcj,bij->bci"}> : () -> ()
    %cst_21 = arith.constant dense<0.000000e+00> : vector<2x8x32xf32>
    %36 = tpu.matmul %12, %34, %cst_21 {dimension_numbers = #tpu.dot_dimension_numbers<[2], [2], [1], [1], [0, 0, 0, 1, 1, 1], [0], [0]>} : vector<2x8x32xf32>, vector<2x32x32xf32>, vector<2x8x32xf32> -> vector<2x8x32xf32>
    "tpu.trace_stop"() : () -> ()
    %37 = tpu.reciprocal %35 : vector<2x32xf32> -> vector<2x32xf32>
    %38 = vector.shape_cast %37 : vector<2x32xf32> to vector<2x1x32xf32>
    %39 = vector.broadcast %38 : vector<2x1x32xf32> to vector<2x8x32xf32>
    %40 = arith.mulf %36, %39 : vector<2x8x32xf32>
    %41 = vector.shape_cast %40 : vector<2x8x32xf32> to vector<16x32xf32>
    %c0_22 = arith.constant 0 : index
    %c0_23 = arith.constant 0 : index
    %42 = vector.load %arg6[%c0_22, %c0_23] : memref<32x256xf32, #tpu.memory_space<vmem>>, vector<32x256xf32>
    %cst_24 = arith.constant dense<0.000000e+00> : vector<16x256xf32>
    %43 = tpu.matmul %41, %42, %cst_24 {dimension_numbers = #tpu.dot_dimension_numbers<[1], [0], [0], [1], [0, 0, 1, 1], [], []>} : vector<16x32xf32>, vector<32x256xf32>, vector<16x256xf32> -> vector<16x256xf32>
    %c0_25 = arith.constant 0 : index
    %c0_26 = arith.constant 0 : index
    %44 = vector.load %arg7[%c0_25, %c0_26] : memref<1x256xf32, #tpu.memory_space<vmem>>, vector<1x256xf32>
    %45 = vector.broadcast %44 : vector<1x256xf32> to vector<16x256xf32>
    %46 = arith.addf %43, %45 : vector<16x256xf32>
    %cst_27 = arith.constant 5.000000e-01 : f32
    %47 = vector.broadcast %cst_27 : f32 to vector<16x256xf32>
    %48 = arith.mulf %47, %46 : vector<16x256xf32>
    %cst_28 = arith.constant 0.707106769 : f32
    %49 = vector.broadcast %cst_28 : f32 to vector<16x256xf32>
    %50 = arith.mulf %46, %49 : vector<16x256xf32>
    %51 = math.erf %50 : vector<16x256xf32>
    %cst_29 = arith.constant 1.000000e+00 : f32
    %52 = vector.broadcast %cst_29 : f32 to vector<16x256xf32>
    %53 = arith.addf %52, %51 : vector<16x256xf32>
    %54 = arith.mulf %48, %53 : vector<16x256xf32>
    %55 = vector.shape_cast %54 : vector<16x256xf32> to vector<2x8x256xf32>
    %c0_30 = arith.constant 0 : index
    %c0_31 = arith.constant 0 : index
    %c0_32 = arith.constant 0 : index
    %56 = vector.load %arg9[%c0_30, %c0_31, %c0_32] : memref<2x8x256xf32, #tpu.memory_space<vmem>>, vector<2x8x256xf32>
    tpu.vector_store %arg9[%c0_30, %c0_31, %c0_32], %55 {strides = array<i32>} : memref<2x8x256xf32, #tpu.memory_space<vmem>>, vector<2x8x256xf32>,
    return
  }
  func.func @transform_0(%arg0: i32) -> (i32, i32, i32) {
    %c0_i32 = arith.constant 0 : i32
    %c0_i32_0 = arith.constant 0 : i32
    %c0_i32_1 = arith.constant 0 : i32
    return %arg0, %c0_i32, %c0_i32_0 : i32, i32, i32
  }
  func.func @transform_1(%arg0: i32) -> (i32, i32, i32) {
    %c0_i32 = arith.constant 0 : i32
    %c0_i32_0 = arith.constant 0 : i32
    %c0_i32_1 = arith.constant 0 : i32
    return %arg0, %c0_i32, %c0_i32_0 : i32, i32, i32
  }
  func.func @transform_2(%arg0: i32) -> (i32, i32) {
    %c0_i32 = arith.constant 0 : i32
    %c0_i32_0 = arith.constant 0 : i32
    %c0_i32_1 = arith.constant 0 : i32
    return %c0_i32, %c0_i32_0 : i32, i32
  }
  func.func @transform_3(%arg0: i32) -> (i32, i32) {
    %c0_i32 = arith.constant 0 : i32
    %c0_i32_0 = arith.constant 0 : i32
    %c0_i32_1 = arith.constant 0 : i32
    return %c0_i32, %c0_i32_0 : i32, i32
  }
  func.func @transform_4(%arg0: i32) -> (i32, i32) {
    %c0_i32 = arith.constant 0 : i32
    %c0_i32_0 = arith.constant 0 : i32
    %c0_i32_1 = arith.constant 0 : i32
    return %c0_i32, %c0_i32_0 : i32, i32
  }
  func.func @transform_5(%arg0: i32) -> (i32, i32) {
    %c0_i32 = arith.constant 0 : i32
    %c0_i32_0 = arith.constant 0 : i32
    %c0_i32_1 = arith.constant 0 : i32
    return %c0_i32, %c0_i32_0 : i32, i32
  }
  func.func @transform_6(%arg0: i32) -> (i32, i32) {
    %c0_i32 = arith.constant 0 : i32
    %c0_i32_0 = arith.constant 0 : i32
    %c0_i32_1 = arith.constant 0 : i32
    return %c0_i32, %c0_i32_0 : i32, i32
  }
  func.func @transform_7(%arg0: i32) -> (i32, i32) {
    %c0_i32 = arith.constant 0 : i32
    %c0_i32_0 = arith.constant 0 : i32
    %c0_i32_1 = arith.constant 0 : i32
    return %c0_i32, %c0_i32_0 : i32, i32
  }
  func.func @transform_8(%arg0: i32) -> (i32, i32, i32) {
    %c0_i32 = arith.constant 0 : i32
    %c0_i32_0 = arith.constant 0 : i32
    %c0_i32_1 = arith.constant 0 : i32
    return %arg0, %c0_i32, %c0_i32_0 : i32, i32, i32
  }
}

</mosaic_0001>

<bundles_post_ra>
// kernel: tpu_custom_call.1
= control target key start
LH: loop header
LB: loop body
LE: loop exit
PB: predicated region body
PF: predicated region fallthrough
CT: control target
= control target key end

     0   :  { %s1987_s0 = inlined_call_operand.vmem [shape: f32[2,8,256], index: 0, kind: input, shape index: {}]   ;;  %s1988_s1 = inlined_call_operand.vmem [shape: f32[2,8,256], index: 1, kind: input, shape index: {}]   ;;  %s1989_s2 = inlined_call_operand.vmem [shape: f32[256,32], index: 2, kind: input, shape index: {}]   ;;  %s1990_s3 = inlined_call_operand.vmem [shape: f32[256,32], index: 3, kind: input, shape index: {}]   ;;  %s1991_s4 = inlined_call_operand.vmem [shape: f32[256,32], index: 4, kind: input, shape index: {}]   ;;  %s1992_s5 = inlined_call_operand.vmem [shape: f32[32,256], index: 5, kind: input, shape index: {}]   ;;  %s1993_s6 = inlined_call_operand.vmem [shape: f32[1,256], index: 6, kind: input, shape index: {}]   ;;  %s1994_s7 = inlined_call_operand.vmem [shape: f32[32,32], index: 7, kind: input, shape index: {}]   ;;  %s1995_s8 = inlined_call_operand.hbm [shape: f32[2,8,256], index: 8, kind: output, shape index: {}]  }
   0x1   :  { %v161_v0 = vld [vmem:[%s1990_s3 + $0x80] sm:$0xff]  ;;  %v162_v1 = vld [vmem:[%s1990_s3 + $0x88] sm:$0xff]  ;;  %v163_v5 = vld [vmem:[%s1990_s3 + $0x90] sm:$0xff] }
   0x2   :  { %v145_v2 = vld [vmem:[%s1990_s3] sm:$0xff]  ;;  %v1328_v3 = vpack.c.bf16 %v162_v1, %v161_v0  ;;  %v146_v4 = vld [vmem:[%s1990_s3 + $0x8] sm:$0xff]  ;;  %v164_v6 = vld [vmem:[%s1990_s3 + $0x98] sm:$0xff] }
   0x3   :  { %v1330_v7 = vpack.c.bf16 %v146_v4, %v145_v2  ;;  %v1332_v8 = vpack.c.bf16 %v164_v6, %v163_v5  ;;  %v147_v9 = vld [vmem:[%s1990_s3 + $0x10] sm:$0xff]  ;;  %v148_v10 = vld [vmem:[%s1990_s3 + $0x18] sm:$0xff]  ;;  %v165_v11 = vld [vmem:[%s1990_s3 + $0xa0] sm:$0xff] }
   0x4   :  { %1329 = vmatprep.subr.bf16.mxu1 %v1328_v3  ;;  %v166_v12 = vld [vmem:[%s1990_s3 + $0xa8] sm:$0xff]  ;;  %v1334_v13 = vpack.c.bf16 %v148_v10, %v147_v9  ;;  %v149_v15 = vld [vmem:[%s1990_s3 + $0x20] sm:$0xff]  ;;  %v167_v17 = vld [vmem:[%s1990_s3 + $0xb0] sm:$0xff] }
   0x5   :  { %1331 = vmatpush3.bf16.msra.mxu1 %v1330_v7  ;;  %v1336_v14 = vpack.c.bf16 %v166_v12, %v165_v11  ;;  %v150_v16 = vld [vmem:[%s1990_s3 + $0x28] sm:$0xff]  ;;  %v168_v18 = vld [vmem:[%s1990_s3 + $0xb8] sm:$0xff]  ;;  %v151_v21 = vld [vmem:[%s1990_s3 + $0x30] sm:$0xff] }
   0x6   :  { %1333 = vmatprep.subr.bf16.mxu1 %v1332_v8  ;;  %v1338_v19 = vpack.c.bf16 %v150_v16, %v149_v15  ;;  %v1340_v20 = vpack.c.bf16 %v168_v18, %v167_v17  ;;  %v152_v22 = vld [vmem:[%s1990_s3 + $0x38] sm:$0xff]  ;;  %v169_v23 = vld [vmem:[%s1990_s3 + $0xc0] sm:$0xff]  ;;  %v170_v24 = vld [vmem:[%s1990_s3 + $0xc8] sm:$0xff] }
   0x7   :  { %v1602_v25 = vld [vmem:[%s1988_s1 + $0x8] sm:$0xff]  ;;  %v153_v26 = vld [vmem:[%s1990_s3 + $0x40] sm:$0xff]  ;;  %v1342_v28 = vpack.c.bf16 %v152_v22, %v151_v21  ;;  %v171_v29 = vld [vmem:[%s1990_s3 + $0xd0] sm:$0xff]  ;;  %v1344_v34 = vpack.c.bf16 %v170_v24, %v169_v23 }
   0x8   :  { %v154_v27 = vld [vmem:[%s1990_s3 + $0x48] sm:$0xff]  ;;  %241 = vmatprep.mubr.f32.mxu1 %v1602_v25  ;;  %v172_v30 = vld [vmem:[%s1990_s3 + $0xd8] sm:$0xff]  ;;  %v54_v31 = vld [vmem:[%s1989_s2 + $0x80] sm:$0xff] }
   0x9   :  { %1335 = vmatpush3.bf16.msra.mxu1 %v1334_v13  ;;  %v55_v32 = vld [vmem:[%s1989_s2 + $0x88] sm:$0xff]  ;;  %v38_v33 = vld [vmem:[%s1989_s2] sm:$0xff]  ;;  %v56_v37 = vld [vmem:[%s1989_s2 + $0x90] sm:$0xff]  ;;  %v1346_v45 = vpack.c.bf16 %v154_v27, %v153_v26  ;;  %v1348_v49 = vpack.c.bf16 %v172_v30, %v171_v29 }
   0xa   :  { %1337 = vmatprep.subr.bf16.mxu1 %v1336_v14  ;;  %v1296_v35 = vpack.c.bf16 %v55_v32, %v54_v31  ;;  %v39_v36 = vld [vmem:[%s1989_s2 + $0x8] sm:$0xff]  ;;  %v57_v38 = vld [vmem:[%s1989_s2 + $0x98] sm:$0xff]  ;;  %v40_v41 = vld [vmem:[%s1989_s2 + $0x10] sm:$0xff] }
   0xb   :  { %v1298_v39 = vpack.c.bf16 %v39_v36, %v38_v33  ;;  %v1300_v40 = vpack.c.bf16 %v57_v38, %v56_v37  ;;  %v41_v42 = vld [vmem:[%s1989_s2 + $0x18] sm:$0xff]  ;;  %v58_v43 = vld [vmem:[%s1989_s2 + $0xa0] sm:$0xff]  ;;  %v59_v44 = vld [vmem:[%s1989_s2 + $0xa8] sm:$0xff] }
   0xc   :  { %1297 = vmatprep.subr.bf16.mxu0 %v1296_v35  ;;  %v155_v46 = vld [vmem:[%s1990_s3 + $0x50] sm:$0xff]  ;;  %v156_v47 = vld [vmem:[%s1990_s3 + $0x58] sm:$0xff]  ;;  %v1302_v48 = vpack.c.bf16 %v41_v42, %v40_v41  ;;  %v173_v50 = vld [vmem:[%s1990_s3 + $0xe0] sm:$0xff]  ;;  %v1304_v51 = vpack.c.bf16 %v59_v44, %v58_v43 }
   0xd   :  { %1339 = vmatpush3.bf16.msra.mxu1 %v1338_v19  ;;  %1299 = vmatpush3.bf16.msra.mxu0 %v1298_v39  ;;  %v42_v52 = vld [vmem:[%s1989_s2 + $0x20] sm:$0xff]  ;;  %v43_v53 = vld [vmem:[%s1989_s2 + $0x28] sm:$0xff]  ;;  %v60_v55 = vld [vmem:[%s1989_s2 + $0xb0] sm:$0xff]  ;;  %v1350_v57 = vpack.c.bf16 %v156_v47, %v155_v46 }
   0xe   :  { %1341 = vmatprep.subr.bf16.mxu1 %v1340_v20  ;;  %1301 = vmatprep.subr.bf16.mxu0 %v1300_v40  ;;  %v174_v54 = vld [vmem:[%s1990_s3 + $0xe8] sm:$0xff]  ;;  %v61_v56 = vld [vmem:[%s1989_s2 + $0xb8] sm:$0xff]  ;;  %v157_v58 = vld [vmem:[%s1990_s3 + $0x60] sm:$0xff]  ;;  %v1306_v61 = vpack.c.bf16 %v43_v53, %v42_v52 }
   0xf   :  { %v158_v59 = vld [vmem:[%s1990_s3 + $0x68] sm:$0xff]  ;;  %v175_v60 = vld [vmem:[%s1990_s3 + $0xf0] sm:$0xff]  ;;  %v1352_v62 = vpack.c.bf16 %v174_v54, %v173_v50  ;;  %v176_v63 = vld [vmem:[%s1990_s3 + $0xf8] sm:$0xff]  ;;  %v1308_v0 = vpack.c.bf16 %v61_v56, %v60_v55 }
  0x10   :  { %v44_v1 = vld [vmem:[%s1989_s2 + $0x30] sm:$0xff]  ;;  %v45_v2 = vld [vmem:[%s1989_s2 + $0x38] sm:$0xff]  ;;  %v62_v3 = vld [vmem:[%s1989_s2 + $0xc0] sm:$0xff]  ;;  %v1354_v6 = vpack.c.bf16 %v158_v59, %v157_v58 }
  0x11   :  { %1343 = vmatpush3.bf16.msra.mxu1 %v1342_v28  ;;  %1303 = vmatpush3.bf16.msra.mxu0 %v1302_v48  ;;  %v63_v4 = vld [vmem:[%s1989_s2 + $0xc8] sm:$0xff]  ;;  %v159_v7 = vld [vmem:[%s1990_s3 + $0x70] sm:$0xff]  ;;  %v1310_v8 = vpack.c.bf16 %v45_v2, %v44_v1 }
  0x12   :  { %1345 = vmatprep.subr.bf16.mxu1 %v1344_v34  ;;  %1305 = vmatprep.subr.bf16.mxu0 %v1304_v51  ;;  %v31_v5 = vld [vmem:[%s1987_s0 + $0x8] sm:$0xff] }
  0x13   :  { %134 = vmatprep.mubr.f32.mxu0 %v31_v5 }
  0x15   :  { %1347 = vmatpush3.bf16.msra.mxu1 %v1346_v45  ;;  %1307 = vmatpush3.bf16.msra.mxu0 %v1306_v61 }
  0x16   :  { %1349 = vmatprep.subr.bf16.mxu1 %v1348_v49 }
  0x19   :  { %1351 = vmatpush3.bf16.msra.mxu1 %v1350_v57 }
  0x1a   :  { %13 = vsyncpa [#allocation3], 0  ;;  %1353 = vmatprep.subr.bf16.mxu1 %v1352_v62  ;;  %v1356_v9 = vpack.c.bf16 %v176_v63, %v175_v60  ;;  %v160_v10 = vld [vmem:[%s1990_s3 + $0x78] sm:$0xff]  ;;  %1309 = vmatprep.subr.bf16.mxu0 %v1308_v0  ;;  %v1312_v11 = vpack.c.bf16 %v63_v4, %v62_v3  ;;  %v46_v12 = vld [vmem:[%s1989_s2 + $0x40] sm:$0xff]  ;;  %vm361_vm0 = vcmask 261120   ;;  %vm440_vm1 = vcmask 64512  }
  0x1b   :  { %v47_v13 = vld [vmem:[%s1989_s2 + $0x48] sm:$0xff]  ;;  %v64_v14 = vld [vmem:[%s1989_s2 + $0xd0] sm:$0xff]  ;;  %v65_v15 = vld [vmem:[%s1989_s2 + $0xd8] sm:$0xff]  ;;  %v1358_v16 = vpack.c.bf16 %v160_v10, %v159_v7  ;;  %1311 = vmatpush3.bf16.msra.mxu0 %v1310_v8  ;;  %vm1495_vm2 = vmmov 0   ;;  %vm904_vm4 = vcmask 130112   ;;  %vm911_vm5 = vcmask 195712  }
  0x1c   :  { %v1314_v17 = vpack.c.bf16 %v47_v13, %v46_v12  ;;  %1313 = vmatprep.subr.bf16.mxu0 %v1312_v11  ;;  %v1316_v18 = vpack.c.bf16 %v65_v15, %v64_v14  ;;  %v48_v19 = vld [vmem:[%s1989_s2 + $0x50] sm:$0xff]  ;;  %v49_v20 = vld [vmem:[%s1989_s2 + $0x58] sm:$0xff]  ;;  %v66_v21 = vld [vmem:[%s1989_s2 + $0xe0] sm:$0xff]  ;;  %vm918_vm6 = vcmask 261312  }
  0x1d   :  { %1355 = vmatpush3.bf16.msra.mxu1 %v1354_v6  ;;  %v67_v22 = vld [vmem:[%s1989_s2 + $0xe8] sm:$0xff]  ;;  %v1731_v23 = vld [vmem:[%s1988_s1] sm:$0xff]  ;;  %v1318_v24 = vpack.c.bf16 %v49_v20, %v48_v19  ;;  %v1736_v26 = vld [vmem:[%s1988_s1 + $0x18] sm:$0xff] }
  0x1e   :  { %1357 = vmatprep.subr.bf16.mxu1 %v1356_v9  ;;  %v1320_v27 = vpack.c.bf16 %v67_v22, %v66_v21  ;;  %v50_v28 = vld [vmem:[%s1989_s2 + $0x60] sm:$0xff]  ;;  %v51_v29 = vld [vmem:[%s1989_s2 + $0x68] sm:$0xff]  ;;  %v68_v30 = vld [vmem:[%s1989_s2 + $0xf0] sm:$0xff] }
  0x1f   :  { %1315 = vmatpush3.bf16.msra.mxu0 %v1314_v17  ;;  %v69_v31 = vld [vmem:[%s1989_s2 + $0xf8] sm:$0xff]  ;;  %v1755_v32 = vld [vmem:[%s1988_s1 + $0x10] sm:$0xff]  ;;  %v1322_v33 = vpack.c.bf16 %v51_v29, %v50_v28  ;;  %v30_v38 = vld [vmem:[%s1987_s0] sm:$0xff] }
  0x20   :  { %1317 = vmatprep.subr.bf16.mxu0 %v1316_v18  ;;  %v1324_v34 = vpack.c.bf16 %v69_v31, %v68_v30  ;;  %v52_v35 = vld [vmem:[%s1989_s2 + $0x70] sm:$0xff]  ;;  %v53_v36 = vld [vmem:[%s1989_s2 + $0x78] sm:$0xff]  ;;  %v268_v28 = vld [vmem:[%s1991_s4 + $0x80] sm:$0xff] }
  0x21   :  { %1359 = vmatpush3.bf16.msra.mxu1 %v1358_v16  ;;  %v1326_v37 = vpack.c.bf16 %v53_v36, %v52_v35  ;;  %v33_v39 = vld [vmem:[%s1987_s0 + $0x18] sm:$0xff]  ;;  %v32_v40 = vld [vmem:[%s1987_s0 + $0x10] sm:$0xff]  ;;  %v269_v29 = vld [vmem:[%s1991_s4 + $0x88] sm:$0xff] }
  0x22   :  { %v1360_v31 = vpack.c.bf16 %v269_v29, %v268_v28  ;;  %v270_v36 = vld [vmem:[%s1991_s4 + $0x90] sm:$0xff]  ;;  %v1496_v28 = vmov 0.0   ;;  %vm1913_vm3 = vmpackc.low %vm361_vm0, %vm361_vm0 }
  0x23   :  { %1319 = vmatpush3.bf16.msra.mxu0 %v1318_v24 }
  0x24   :  { %242 = vmatmul.mubr.f32.vlgmr.msra.gmra.mrb[0].mxu1 %v1731_v23  ;;  %1321 = vmatprep.subr.bf16.mxu0 %v1320_v27 }
  0x25   :  { %246 = vmatprep.mubr.f32.mxu1 %v1736_v26 }
  0x27   :  { %1323 = vmatpush3.bf16.msra.mxu0 %v1322_v33  ;;  %v252_v33 = vld [vmem:[%s1991_s4] sm:$0xff] }
  0x28   :  { %247 = vmatmul.mubr.f32.gmra.mrb[2].mxu1 %v1755_v32  ;;  %1325 = vmatprep.subr.bf16.mxu0 %v1324_v34  ;;  %v253_v34 = vld [vmem:[%s1991_s4 + $0x8] sm:$0xff] }
  0x29   :  { %v1362_v35 = vpack.c.bf16 %v253_v34, %v252_v33 }
  0x2b   :  { %1327 = vmatpush3.bf16.msra.mxu0 %v1326_v37  ;;  %v271_v37 = vld [vmem:[%s1991_s4 + $0x98] sm:$0xff] }
  0x2c   :  { %1361 = vmatprep.subr.bf16.mxu0 %v1360_v31 }
  0x2e   :  { %135 = vmatmul.mubr.f32.vlgmr.msra.gmra.mrb[0].mxu0 %v30_v38  ;;  %v1364_v38 = vpack.c.bf16 %v271_v37, %v270_v36  ;;  %v405_v36 = vld [vmem:[%s1994_s7 + $0x8] sm:$0xff]  ;;  %v404_v37 = vld [vmem:[%s1994_s7] sm:$0xff] }
  0x2f   :  { %139 = vmatprep.mubr.f32.mxu0 %v33_v39  ;;  %1363 = vmatpush3.bf16.msra.mxu0 %v1362_v35  ;;  %v254_v39 = vld [vmem:[%s1991_s4 + $0x10] sm:$0xff] }
  0x30   :  { %1365 = vmatprep.subr.bf16.mxu0 %v1364_v38 }
  0x32   :  { %140 = vmatmul.mubr.f32.gmra.mrb[2].mxu0 %v32_v40  ;;  %v255_v40 = vld [vmem:[%s1991_s4 + $0x18] sm:$0xff] }
  0x33   :  { %348 = vmatprep.mubr.f32.mxu0 %v1602_v25 }
  0xf7   :  { %v1194_v41 = vpop.f32.mrb[0].mxu1 }
  0xf8   :  { %v1195_v42 = vpop.f32.mrb[1].mxu1 }
  0xf9   :  { %v1196_v43 = vadd.f32 %v1195_v42, %v1194_v41  ;;  %v1366_v41 = vpack.c.bf16 %v255_v40, %v254_v39 }
  0xfb   :  { %v382_v44 = vmul.f32 %v1196_v43, %v1196_v43  ;;  %v1197_v45 = vpop.f32.mrb[2].mxu1  ;;  %1367 = vmatpush3.bf16.msra.mxu0 %v1366_v41 }
  0xfc   :  { %v1198_v46 = vpop.f32.mrb[3].mxu1 }
  0xfd   :  { %v384_v47 = vsel %vm361_vm0, %v382_v44, 0.0  ;;  %v1775_v48 = vadd.f32 %v1198_v46, %v1197_v45  ;;  %v272_v44 = vld [vmem:[%s1991_s4 + $0xa0] sm:$0xff]  ;;  %v273_v45 = vld [vmem:[%s1991_s4 + $0xa8] sm:$0xff] }
  0xfe   :  { %v385_v49 = vrot.slane %v384_v47, 4 }
  0xff   :  { %v383_v50 = vmul.f32 %v1775_v48, %v1775_v48 }
 0x100   :  { %v386_v51 = vadd.f32 %v385_v49, %v384_v47  ;;  %v1368_v47 = vpack.c.bf16 %v273_v45, %v272_v44  ;;  %v256_v49 = vld [vmem:[%s1991_s4 + $0x20] sm:$0xff]  ;;  %v407_v44 = vld [vmem:[%s1994_s7 + $0x18] sm:$0xff]  ;;  %v406_v45 = vld [vmem:[%s1994_s7 + $0x10] sm:$0xff] }
 0x101   :  { %v391_v52 = vsel %vm361_vm0, %v383_v50, 0.0  ;;  %v1156_v54 = vpop.f32.mrb[0].mxu0  ;;  %v257_v50 = vld [vmem:[%s1991_s4 + $0x28] sm:$0xff] }
 0x102   :  { %v387_v53 = vrot.slane %v386_v51, 2  ;;  %v392_v25 = vrot.slane %v391_v52, 4  ;;  %v1157_v57 = vpop.f32.mrb[1].mxu0  ;;  %1369 = vmatprep.subr.bf16.mxu0 %v1368_v47 }
 0x103   :  { %v1158_v58 = vadd.f32 %v1157_v57, %v1156_v54  ;;  %v275_v54 = vld [vmem:[%s1991_s4 + $0xb8] sm:$0xff] }
 0x104   :  { %v388_v55 = vadd.f32 %v387_v53, %v386_v51  ;;  %v393_v56 = vadd.f32 %v392_v25, %v391_v52  ;;  %v1370_v52 = vpack.c.bf16 %v257_v50, %v256_v49  ;;  %v274_v25 = vld [vmem:[%s1991_s4 + $0xb0] sm:$0xff]  ;;  %v259_v57 = vld [vmem:[%s1991_s4 + $0x38] sm:$0xff] }
 0x105   :  { %v359_v61 = vmul.f32 %v1158_v58, %v1158_v58  ;;  %v1159_v62 = vpop.f32.mrb[2].mxu0 }
 0x106   :  { %v389_v59 = vrot.slane %v388_v55, 1  ;;  %v394_v60 = vrot.slane %v393_v56, 2  ;;  %v1160_v1 = vpop.f32.mrb[3].mxu0  ;;  %1371 = vmatpush3.bf16.msra.mxu0 %v1370_v52 }
 0x107   :  { %v362_v2 = vsel %vm361_vm0, %v359_v61, 0.0  ;;  %v1161_v3 = vadd.f32 %v1160_v1, %v1159_v62  ;;  %v260_v62 = vld [vmem:[%s1991_s4 + $0x40] sm:$0xff]  ;;  %v278_v1 = vld [vmem:[%s1991_s4 + $0xd0] sm:$0xff] }
 0x108   :  { %v390_v63 = vadd.f32 %v389_v59, %v388_v55  ;;  %v395_v0 = vadd.f32 %v394_v60, %v393_v56  ;;  %v363_v5 = vrot.slane %v362_v2, 4  ;;  %v1372_v56 = vpack.c.bf16 %v275_v54, %v274_v25  ;;  %v276_v59 = vld [vmem:[%s1991_s4 + $0xc0] sm:$0xff]  ;;  %v277_v60 = vld [vmem:[%s1991_s4 + $0xc8] sm:$0xff] }
 0x109   :  { %v360_v7 = vmul.f32 %v1161_v3, %v1161_v3  ;;  %v1376_v61 = vpack.c.bf16 %v277_v60, %v276_v59 }
 0x10a   :  { %v398_v4 = vmax.f32 %v390_v63, 1e-24  ;;  %v396_v6 = vrot.slane %v395_v0, 1  ;;  %v364_v8 = vadd.f32 %v363_v5, %v362_v2  ;;  %1373 = vmatprep.subr.bf16.mxu0 %v1372_v56  ;;  %v261_v63 = vld [vmem:[%s1991_s4 + $0x48] sm:$0xff]  ;;  %v279_v2 = vld [vmem:[%s1991_s4 + $0xd8] sm:$0xff] }
 0x10b   :  { %v369_v9 = vsel %vm361_vm0, %v360_v7, 0.0  ;;  %v263_v5 = vld [vmem:[%s1991_s4 + $0x58] sm:$0xff]  ;;  %v280_v7 = vld [vmem:[%s1991_s4 + $0xe0] sm:$0xff] }
 0x10c   :  { %1422 = vrsqrt.f32 %v398_v4  ;;  %v365_v10 = vrot.slane %v364_v8, 2  ;;  %v370_v11 = vrot.slane %v369_v9, 4  ;;  %v397_v12 = vadd.f32 %v396_v6, %v395_v0  ;;  %v262_v4 = vld [vmem:[%s1991_s4 + $0x50] sm:$0xff] }
 0x10d   :  { %v1378_v0 = vpack.c.bf16 %v261_v63, %v260_v62  ;;  %v1382_v6 = vpack.c.bf16 %v263_v5, %v262_v4 }
 0x10e   :  { %v366_v13 = vadd.f32 %v365_v10, %v364_v8  ;;  %v371_v14 = vadd.f32 %v370_v11, %v369_v9  ;;  %v399_v17 = vmax.f32 %v397_v12, 1e-24  ;;  %v281_v8 = vld [vmem:[%s1991_s4 + $0xe8] sm:$0xff]  ;;  %v264_v10 = vld [vmem:[%s1991_s4 + $0x60] sm:$0xff] }
 0x10f   :  { %v1384_v9 = vpack.c.bf16 %v281_v8, %v280_v7  ;;  %v265_v11 = vld [vmem:[%s1991_s4 + $0x68] sm:$0xff] }
 0x110   :  { %v367_v15 = vrot.slane %v366_v13, 1  ;;  %v372_v16 = vrot.slane %v371_v14, 2  ;;  %1424 = vrsqrt.f32 %v399_v17  ;;  %v1386_v12 = vpack.c.bf16 %v265_v11, %v264_v10  ;;  %v267_v17 = vld [vmem:[%s1991_s4 + $0x78] sm:$0xff] }
 0x112   :  { %v368_v18 = vadd.f32 %v367_v15, %v366_v13  ;;  %v373_v19 = vadd.f32 %v372_v16, %v371_v14  ;;  %v282_v13 = vld [vmem:[%s1991_s4 + $0xf0] sm:$0xff]  ;;  %v283_v14 = vld [vmem:[%s1991_s4 + $0xf8] sm:$0xff] }
 0x113   :  { %v266_v15 = vld [vmem:[%s1991_s4 + $0x70] sm:$0xff]  ;;  %v1388_v16 = vpack.c.bf16 %v283_v14, %v282_v13 }
 0x114   :  { %v376_v21 = vmax.f32 %v368_v18, 1e-24  ;;  %v374_v22 = vrot.slane %v373_v19, 1  ;;  %v1390_v18 = vpack.c.bf16 %v267_v17, %v266_v15 }
 0x116   :  { %v1423_v20 = vpop.eup %1422  ;;  %1426 = vrsqrt.f32 %v376_v21  ;;  %v375_v27 = vadd.f32 %v374_v22, %v373_v19 }
 0x117   :  { %v402_v24 = vmul.f32 %v1423_v20, %v1196_v43 }
 0x118   :  { %v377_v30 = vmax.f32 %v375_v27, 1e-24  ;;  %v1494_v27 = vmov 0.0|0.0  }
 0x119   :  { %408 = vxpose.xlu0.b32.start.end [1/1] (short) (narrow) %v402_v24, 32 }
 0x11a   :  { %1428 = vrsqrt.f32 %v377_v30  ;;  %v1425_v42 = vpop.eup %1424 }
 0x11b   :  { %v403_v51 = vmul.f32 %v1425_v42, %v1775_v48  ;;  %v258_v48 = vld [vmem:[%s1991_s4 + $0x30] sm:$0xff] }
 0x120   :  { %v1427_v43 = vpop.eup %1426 }
 0x121   :  { %v380_v46 = vmul.f32 %v1427_v43, %v1158_v58  ;;  %v1374_v58 = vpack.c.bf16 %v259_v57, %v258_v48 }
 0x123   :  { %1258 = vmatprep.subr.mxu1 %v380_v46  ;;  %1375 = vmatpush3.bf16.msra.mxu0 %v1374_v58 }
 0x124   :  { %v1429_v53 = vpop.eup %1428  ;;  %1259 = vmatpush3.msra.mxu1 %v380_v46  ;;  %1377 = vmatprep.subr.bf16.mxu0 %v1376_v61 }
 0x125   :  { %v381_v55 = vmul.f32 %v1429_v53, %v1161_v3  ;;  %v1380_v3 = vpack.c.bf16 %v279_v2, %v278_v1 }
 0x126   :  { %538 = vxpose.xlu0.b32.start.end [1/1] (short) (narrow) %v403_v51, 32 }
 0x127   :  { %1266 = vmatprep.subr.mxu1 %v381_v55  ;;  %1379 = vmatpush3.bf16.msra.mxu0 %v1378_v0 }
 0x128   :  { %1381 = vmatprep.subr.bf16.mxu0 %v1380_v3 }
 0x12b   :  { %1383 = vmatpush3.bf16.msra.mxu0 %v1382_v6 }
 0x12c   :  { %1385 = vmatprep.subr.bf16.mxu0 %v1384_v9 }
 0x12f   :  { %1387 = vmatpush3.bf16.msra.mxu0 %v1386_v12 }
 0x130   :  { %1389 = vmatprep.subr.bf16.mxu0 %v1388_v16 }
 0x133   :  { %1391 = vmatpush3.bf16.msra.mxu0 %v1390_v18 }
 0x134   :  { %1400 = vmatprep.subr.bf16.mxu0 %v1494_v27 }
 0x136   :  { %349 = vmatmul.mubr.f32.vlgmr.msra.gmra.mrb[4].mxu0 %v1731_v23 }
 0x137   :  { %353 = vmatprep.mubr.f32.mxu0 %v1736_v26 }
 0x13a   :  { %354 = vmatmul.mubr.f32.gmra.mrb[6].mxu0 %v1755_v32 }
 0x13b   :  { %1293 = vmatprep.mubr.msk.f32.mxu0 %vm1495_vm2, %v1496_v28 }
 0x199   :  { %v424_v19 = vpop.trf.xlu0 }
 0x19a   :  { %1260 = vmatprep.mubr.msk.f32.mxu1 %vm440_vm1, %v424_v19 }
 0x19d   :  { %v425_v20 = vpop.trf.xlu0 }
 0x19e   :  { %1261 = vmatmul.mubr.msk.f32.vlgmr.msra.gmra.mrb[4].mxu1 %vm440_vm1, %v425_v20  ;;  %v962_v20 = vld [vmem:[%s1992_s5 + $0x8] sm:$0xff] }
 0x19f   :  { %1267 = vmatpush3.msra.mxu1 %v381_v55 }
 0x1a0   :  { %1392 = vmatprep.subr.bf16.mxu1 %v1494_v27 }
 0x1a1   :  { %v426_v21 = vpop.trf.xlu0 }
 0x1a2   :  { %1263 = vmatprep.mubr.msk.f32.mxu1 %vm440_vm1, %v426_v21  ;;  %v964_v21 = vld [vmem:[%s1992_s5 + $0x18] sm:$0xff] }
 0x1a5   :  { %v427_v22 = vpop.trf.xlu0 }
 0x1a6   :  { %1264 = vmatmul.mubr.msk.f32.gmra.mrb[6].mxu1 %vm440_vm1, %v427_v22  ;;  %v961_v22 = vld [vmem:[%s1992_s5] sm:$0xff] }
 0x1a9   :  { %v554_v24 = vpop.trf.xlu0 }
 0x1aa   :  { %1268 = vmatprep.mubr.msk.f32.mxu1 %vm440_vm1, %v554_v24  ;;  %v1408_v24 = vpack.c.bf16 %v964_v21, %v962_v20 }
 0x1ad   :  { %v555_v23 = vpop.trf.xlu0 }
 0x1ae   :  { %1269 = vmatmul.mubr.msk.f32.vlgmr.msra.gmra.mrb[8].mxu1 %vm440_vm1, %v555_v23  ;;  %v963_v23 = vld [vmem:[%s1992_s5 + $0x10] sm:$0xff] }
 0x1b1   :  { %v556_v26 = vpop.trf.xlu0 }
 0x1b2   :  { %1271 = vmatprep.mubr.msk.f32.mxu1 %vm440_vm1, %v556_v26  ;;  %v966_v26 = vld [vmem:[%s1992_s5 + $0x28] sm:$0xff] }
 0x1b5   :  { %v557_v32 = vpop.trf.xlu0 }
 0x1b6   :  { %1272 = vmatmul.mubr.msk.f32.gmra.mrb[10].mxu1 %vm440_vm1, %v557_v32  ;;  %v968_v32 = vld [vmem:[%s1992_s5 + $0x38] sm:$0xff] }
 0x1b7   :  { %1282 = vmatprep.mubr.msk.f32.mxu1 %vm1495_vm2, %v1496_v28 }
 0x209   :  { %v1232_v29 = vpop.f32.mrb[4].mxu0 }
 0x20a   :  { %v1233_v30 = vpop.f32.mrb[5].mxu0 }
 0x20b   :  { %v1894_v31 = vadd.f32 %v1233_v30, %v1232_v29  ;;  %v1412_v29 = vpack.c.bf16 %v968_v32, %v966_v26  ;;  %v965_v30 = vld [vmem:[%s1992_s5 + $0x20] sm:$0xff] }
 0x20d   :  { %v1235_v33 = vpop.f32.mrb[6].mxu0 }
 0x20e   :  { %v1236_v34 = vpop.f32.mrb[7].mxu0 }
 0x20f   :  { %v1896_v35 = vadd.f32 %v1236_v34, %v1235_v33 }
 0x271   :  { %v1262_v38 = vpop.f32.mrb[4].mxu1 }
 0x272   :  { %v525_v39 = vadd.f32 %v1262_v38, %v405_v36  ;;  %v519_v40 = vpop.f32.mrb[5].mxu1  ;;  %v893_v38 = vlaneseq }
 0x273   :  { %v520_v41 = vadd.f32 %v519_v40, %v404_v37 }
 0x274   :  { %v669_v42 = vmul.f32 1.442695, %v525_v39  ;;  %v894_v39 = vand.u32 127, %v893_v38 }
 0x275   :  { %v667_v43 = vmul.f32 1.442695, %v520_v41 }
 0x276   :  { %1430 = vpow2.f32 %v669_v42  ;;  %v906_v40 = vadd.s32 4294967280, %v894_v39  ;;  %v896_v42 = vshrl.u32 %v893_v38, 7 }
 0x277   :  { %1432 = vpow2.f32 %v667_v43  ;;  %v899_v43 = vadd.s32 4294967288, %v894_v39 }
 0x279   :  { %v1265_v46 = vpop.f32.mrb[6].mxu1 }
 0x27a   :  { %v535_v47 = vadd.f32 %v1265_v46, %v407_v44  ;;  %v529_v49 = vpop.f32.mrb[7].mxu1  ;;  %v909_v46 = vsub.s32 %v906_v40, %v896_v42 }
 0x27b   :  { %v530_v50 = vadd.f32 %v529_v49, %v406_v45 }
 0x27c   :  { %v673_v51 = vmul.f32 1.442695, %v535_v47 }
 0x27d   :  { %v671_v52 = vmul.f32 1.442695, %v530_v50  ;;  %v902_v50 = vsub.s32 %v899_v43, %v896_v42 }
 0x27e   :  { %1434 = vpow2.f32 %v673_v51  ;;  %v913_v51 = vadd.s32 4294967272, %v894_v39 }
 0x27f   :  { %1436 = vpow2.f32 %v671_v52 }
 0x280   :  { %v1431_v53 = vpop.eup %1430  ;;  %v916_v56 = vsub.s32 %v913_v51, %v896_v42 }
 0x281   :  { %v1433_v25 = vpop.eup %1432  ;;  %v1270_v54 = vpop.f32.mrb[8].mxu1  ;;  %v686_v55 = vsel %vm361_vm0, %v1431_v53, 0.0 }
 0x282   :  { %v654_v48 = vadd.f32 %v1270_v54, %v405_v36  ;;  %687 = vadd.xlane.f32.xlu1 %v686_v55  ;;  %v648_v57 = vpop.f32.mrb[9].mxu1  ;;  %v1393_v58 = vpack.c.bf16 %v1431_v53, %v1433_v25  ;;  %v683_v62 = vsel %vm361_vm0, %v1433_v25, 0.0 }
 0x283   :  { %v649_v59 = vadd.f32 %v648_v57, %v404_v37 }
 0x284   :  { %v677_v60 = vmul.f32 1.442695, %v654_v48  ;;  %1395 = vmatpush3.bf16.xpose.msk.msra.mxu1 %vm1913_vm3, %v1393_v58 }
 0x285   :  { %v675_v61 = vmul.f32 1.442695, %v649_v59  ;;  %1396 = vmatprep.subr.bf16.mxu1 %v1494_v27 }
 0x286   :  { %1438 = vpow2.f32 %v677_v60  ;;  %684 = vadd.xlane.f32.xlu1 %v683_v62 }
 0x287   :  { %1440 = vpow2.f32 %v675_v61 }
 0x288   :  { %v1435_v63 = vpop.eup %1434 }
 0x289   :  { %v1437_v0 = vpop.eup %1436  ;;  %v1273_v1 = vpop.f32.mrb[10].mxu1  ;;  %v692_v2 = vsel %vm361_vm0, %v1435_v63, 0.0 }
 0x28a   :  { %v664_v3 = vadd.f32 %v1273_v1, %v407_v44  ;;  %v658_v4 = vpop.f32.mrb[11].mxu1  ;;  %693 = vadd.xlane.f32.xlu1 %v692_v2  ;;  %v1397_v5 = vpack.c.bf16 %v1435_v63, %v1437_v0  ;;  %v689_v9 = vsel %vm361_vm0, %v1437_v0, 0.0  ;;  %v897_v44 = vsub.s32 %v894_v39, %v896_v42 }
 0x28b   :  { %v659_v6 = vadd.f32 %v658_v4, %v406_v45 }
 0x28c   :  { %v681_v7 = vmul.f32 1.442695, %v664_v3  ;;  %1399 = vmatpush3.bf16.xpose.msk.msra.mxu1 %vm1913_vm3, %v1397_v5 }
 0x28d   :  { %v679_v8 = vmul.f32 1.442695, %v659_v6  ;;  %1409 = vmatprep.subr.bf16.mxu1 %v1408_v24 }
 0x28e   :  { %1442 = vpow2.f32 %v681_v7  ;;  %690 = vadd.xlane.f32.xlu1 %v689_v9 }
 0x28f   :  { %1444 = vpow2.f32 %v679_v8 }
 0x290   :  { %v1439_v10 = vpop.eup %1438 }
 0x291   :  { %v1441_v11 = vpop.eup %1440  ;;  %v698_v12 = vsel %vm361_vm0, %v1439_v10, 0.0 }
 0x292   :  { %699 = vadd.xlane.f32.xlu0 %v698_v12  ;;  %v695_v13 = vsel %vm361_vm0, %v1441_v11, 0.0  ;;  %v1401_v14 = vpack.c.bf16 %v1439_v10, %v1441_v11 }
 0x293   :  { %1283 = vmatmul.mubr.msk.f32.vlgmr.msra.gmra.mrb[12].mxu1 %vm361_vm0, %v1894_v31  ;;  %696 = vadd.xlane.f32.xlu1 %v695_v13  ;;  %v967_v31 = vld [vmem:[%s1992_s5 + $0x30] sm:$0xff] }
 0x294   :  { %1403 = vmatpush3.bf16.xpose.msk.msra.mxu0 %vm1913_vm3, %v1401_v14  ;;  %1051 = vmatprep.mubr.f32.mxu1 %v1496_v28  ;;  %v1414_v33 = vpack.c.bf16 %v967_v31, %v965_v30 }
 0x295   :  { %1404 = vmatprep.subr.bf16.mxu0 %v1494_v27  ;;  %v1410_v27 = vpack.c.bf16 %v963_v23, %v961_v22 }
 0x297   :  { %1411 = vmatpush1.bf16.msra.mxu1 %v1410_v27 }
 0x298   :  { %v1443_v15 = vpop.eup %1442  ;;  %1413 = vmatprep.subr.bf16.mxu1 %v1412_v29 }
 0x299   :  { %v1445_v16 = vpop.eup %1444  ;;  %v704_v19 = vsel %vm361_vm0, %v1443_v15, 0.0 }
 0x29a   :  { %v701_v17 = vsel %vm361_vm0, %v1445_v16, 0.0  ;;  %v1405_v18 = vpack.c.bf16 %v1443_v15, %v1445_v16  ;;  %v969_v15 = vld [vmem:[%s1993_s6] sm:$0x3]  ;;  %v977_v16 = vsub.s32 1, %v896_v42  ;;  %s1497_s6 = smov [#allocation2]  }
 0x29b   :  { %702 = vadd.xlane.f32.xlu1 %v701_v17  ;;  %1415 = vmatpush1.bf16.msra.mxu1 %v1414_v33  ;;  %s1093_s21 = sshll.u32 %s1497_s6, 4  ;;  %s1094_s21 = int_to_ptr.vmem [resolvable:$true] %s1093_s21 }
 0x29c   :  { %1407 = vmatpush3.bf16.xpose.msk.msra.mxu0 %vm1913_vm3, %v1405_v18  ;;  %v978_v18 = vrot.slane %v969_v15, %v977_v16  ;;  %s1470_s22 = scalar_lea.vmem %s1094_s21, 512  ;;  %p1475_p1 = scmp.lt.s32.totalorder %s1094_s21, %s1094_s21 }
 0x29d   :  { %p1471_p0 = scmp.ne.s32.totalorder %s1094_s21, %s1470_s22  ;;  %p1476_p2 = scmp.lt.s32.totalorder %s1470_s22, %s1470_s22 }
 0x29f   :  { %705 = vadd.xlane.f32.xlu1 %v704_v19  ;;  %p1477_p3 = por %p1476_p2, %p1475_p1 }
 0x2a1   :  { %p1478_p4 = pnand %p1477_p3, %p1471_p0 }
 0x2a3   :  { %1294 = vmatmul.mubr.msk.f32.vlgmr.msra.gmra.mrb[8].mxu0 %vm361_vm0, %v1896_v35 }
 0x30f   :  { %v688_v34 = vpop.xlane.xlu1 %687 }
 0x313   :  { %v685_v35 = vpop.xlane.xlu1 %684 }
 0x314   :  { %1446 = vrcp.f32 %v685_v35 }
 0x317   :  { %v694_v36 = vpop.xlane.xlu1 %693 }
 0x31b   :  { %v691_v37 = vpop.xlane.xlu1 %690 }
 0x31c   :  { %1448 = vrcp.f32 %v691_v37 }
 0x31d   :  { %1450 = vrcp.f32 %v688_v34 }
 0x31e   :  { %1452 = vrcp.f32 %v694_v36  ;;  %v1447_v45 = vpop.eup %1446 }
 0x31f   :  { %v898_v53 = vrot.slane %v1447_v45, %v897_v44  ;;  %v700_v25 = vpop.xlane.xlu0 %699 }
 0x320   :  { %v697_v41 = vpop.xlane.xlu1 %696  ;;  %1454 = vrcp.f32 %v700_v25 }
 0x321   :  { %1456 = vrcp.f32 %v697_v41 }
 0x326   :  { %v1449_v47 = vpop.eup %1448 }
 0x327   :  { %v1451_v52 = vpop.eup %1450  ;;  %v910_v54 = vrot.slane %v1449_v47, %v909_v46 }
 0x328   :  { %v703_v49 = vpop.xlane.xlu1 %702  ;;  %v903_v55 = vrot.slane %v1451_v52, %v902_v50  ;;  %v1453_v48 = vpop.eup %1452 }
 0x329   :  { %1458 = vrcp.f32 %v703_v49  ;;  %v917_v60 = vrot.slane %v1453_v48, %v916_v56 }
 0x32a   :  { %v905_v58 = vsel %vm904_vm4, %v903_v55, %v898_v53  ;;  %v1455_v1 = vpop.eup %1454 }
 0x32b   :  { %v912_v59 = vsel %vm911_vm5, %v910_v54, %v905_v58  ;;  %v1457_v2 = vpop.eup %1456  ;;  %v927_v6 = vrot.slane %v1455_v1, %v902_v50 }
 0x32c   :  { %v706_v57 = vpop.xlane.xlu1 %705  ;;  %v919_v62 = vsel %vm918_vm6, %v917_v60, %v912_v59  ;;  %v923_v5 = vrot.slane %v1457_v2, %v897_v44 }
 0x32d   :  { %1460 = vrcp.f32 %v706_v57 }
 0x32e   :  { %v928_v9 = vsel %vm904_vm4, %v927_v6, %v923_v5 }
 0x333   :  { %v1459_v3 = vpop.eup %1458 }
 0x334   :  { %v932_v7 = vrot.slane %v1459_v3, %v909_v46 }
 0x336   :  { %v933_v10 = vsel %vm911_vm5, %v932_v7, %v928_v9 }
 0x337   :  { %v1461_v4 = vpop.eup %1460 }
 0x338   :  { %v937_v8 = vrot.slane %v1461_v4, %v916_v56 }
 0x33a   :  { %v938_v12 = vsel %vm918_vm6, %v937_v8, %v933_v10 }
 0x366   :  { %v788_v61 = vpop.f32.mrb[12].mxu1 }
 0x367   :  { %v959_v63 = vmul.f32 %v919_v62, %v788_v61  ;;  %v1284_v0 = vpop.f32.mrb[13].mxu1 }
 0x369   :  { %1122 = vmatmul.mubr.msk.f32.vlgmr.msra.gmra.mrb[14].mxu1 %vm361_vm0, %v959_v63 }
 0x36a   :  { %1057 = vmatprep.mubr.f32.mxu1 %v1496_v28  ;;  %v973_v28 = vsub.s32 0, %v896_v42 }
 0x36c   :  { %v974_v17 = vrot.slane %v969_v15, %v973_v28 }
 0x376   :  { %v873_v11 = vpop.f32.mrb[8].mxu0 }
 0x377   :  { %v960_v13 = vmul.f32 %v938_v12, %v873_v11  ;;  %v1295_v14 = vpop.f32.mrb[9].mxu0 }
 0x379   :  { %1123 = vmatmul.mubr.msk.f32.gmra.mrb[16].mxu1 %vm361_vm0, %v960_v13 }
 0x43c   :  { %v1053_v19 = vpop.f32.mrb[14].mxu1 }
 0x43d   :  { %v1054_v20 = vadd.f32 %v1053_v19, %v974_v17  ;;  %v1055_v21 = vpop.f32.mrb[15].mxu1 }
 0x43e   :  { %v1056_v22 = vadd.f32 %v1055_v21, %v978_v18 }
 0x43f   :  { %v1068_v24 = vmul.f32 0.70710677, %v1054_v20  ;;  %v1064_v27 = vmul.f32 0.5, %v1054_v20 }
 0x440   :  { %v1069_v23 = vmul.f32 0.70710677, %v1056_v22  ;;  %v1065_v31 = vmul.f32 0.5, %v1056_v22 }
 0x441   :  { %1462 = verf.f32 %v1068_v24 }
 0x442   :  { %1464 = verf.f32 %v1069_v23 }
 0x44b   :  { %v1463_v26 = vpop.eup %1462 }
 0x44c   :  { %v1465_v32 = vpop.eup %1464  ;;  %v1076_v29 = vadd.f32 1.0, %v1463_v26  ;;  %v1059_v30 = vpop.f32.mrb[16].mxu1 }
 0x44d   :  { %v1077_v33 = vadd.f32 1.0, %v1465_v32  ;;  %v1060_v34 = vadd.f32 %v1059_v30, %v974_v17  ;;  %v1061_v35 = vpop.f32.mrb[17].mxu1 }
 0x44e   :  { %v1080_v36 = vmul.f32 %v1076_v29, %v1064_v27  ;;  %v1062_v37 = vadd.f32 %v1061_v35, %v978_v18 }
 0x44f   :  { %v1081_v38 = vmul.f32 %v1077_v33, %v1065_v31  ;;  %v1070_v39 = vmul.f32 0.70710677, %v1060_v34  ;;  %v1066_v43 = vmul.f32 0.5, %v1060_v34 }
 0x450   :  { %1084 = vst [vmem:[#allocation2] sm:$0xff] %v1080_v36  ;;  %v1071_v40 = vmul.f32 0.70710677, %v1062_v37  ;;  %v1067_v45 = vmul.f32 0.5, %v1062_v37 }
 0x451   :  { %1085 = vst [vmem:[#allocation2 + $0x8] sm:$0xff] %v1081_v38  ;;  %1466 = verf.f32 %v1070_v39 }
 0x452   :  { %1468 = verf.f32 %v1071_v40 }
 0x45b   :  { %v1467_v41 = vpop.eup %1466 }
 0x45c   :  { %v1469_v42 = vpop.eup %1468  ;;  %v1078_v44 = vadd.f32 1.0, %v1467_v41 }
 0x45d   :  { %v1079_v46 = vadd.f32 1.0, %v1469_v42 }
 0x45e   :  { %v1082_v47 = vmul.f32 %v1078_v44, %v1066_v43 }
 0x45f   :  { %v1083_v49 = vmul.f32 %v1079_v46, %v1067_v45 }
 0x460   :  { %1086 = vst [vmem:[#allocation2 + $0x10] sm:$0xff] %v1082_v47 }
 0x461   :  { %1087 = vst [vmem:[#allocation2 + $0x18] sm:$0xff] %v1083_v49 }
 0x462   :  { %1481 = shalt.err (!%p1478_p4)
}
 0x463   :  { %s1482_s24 = scalar_lea.hbm %s1995_s8, 512 }
 0x464   :  { %p1483_p5 = scmp.ne.s32.totalorder %s1995_s8, %s1482_s24  ;;  %p1486_p6 = scmp.lt.u32.totalorder %s1482_s24, %s1995_s8 }
 0x466   :  { %p1488_p7 = pnand %p1486_p6, %p1483_p5 }
 0x468   :  { %1491 = shalt.err (!%p1488_p7)
}
 0x469   :  { %s1498_s3 = smov 256   ;;  %s1499_s29 = smov 16  }
 0x46a   :  { %1099 = dma.vmem_to_hbm [thread:$0]  %s1094_s21, 512, %s1995_s8, [#allocation3], %s1498_s3, %s1498_s3, %s1499_s29  }
 0x46b   :  { %1492 = dma.done.wait [#allocation3], 512  }
 0x46c   :  { %1493 = vsyncadd [#allocation3], 4294966784 }
 0x46d   :  { %1103 = vsyncpa [#allocation3], 1 }

</bundles_post_ra>
